<compile_context>
chip_gen: v6e
topology: v6e:2x2x1
jax: 0.10.0
libtpu: 0.0.40
codegen_flags: <defaults>
</compile_context>

<pallas_src>
import functools

import jax
import jax.numpy as jnp
from jax.experimental import pallas as pl
from jax.experimental.pallas import tpu as pltpu

_MASK = -1e30      # large-negative logit used for padded lanes / running-max init
_LN_EPS = 1e-5


def _round_up(x, m):
    return (x + m - 1) // m * m


def _vmem_capacity_bytes():
    """Physical VMEM per TensorCore; conservative v7x-sized fallback if not queryable."""
    try:
        fn = getattr(pltpu, "get_tpu_info", None)
        if fn is not None:
            info = fn()
            for name in ("vmem_capacity_bytes", "vmem_size_bytes"):
                v = getattr(info, name, None)
                if v:
                    return int(v)
    except Exception:
        pass
    return 64 << 20


def _channel_mlp(context, w1, b1, g, be, w2, b2):
    """Conv1x1(C->P) -> LayerNorm([P,1,1]) -> ReLU -> Conv1x1(P->C) on a (C, 1) vector."""
    y1 = jnp.dot(w1, context, preferred_element_type=jnp.float32) + b1        # (P, 1)
    mu = jnp.mean(y1, axis=0, keepdims=True)
    var = jnp.mean((y1 - mu) * (y1 - mu), axis=0, keepdims=True)
    yn = (y1 - mu) * jax.lax.rsqrt(var + _LN_EPS) * g + be
    yr = jnp.maximum(yn, 0.0)
    return jnp.dot(w2, yr, preferred_element_type=jnp.float32) + b2           # (C, 1)


# --------------------------------------------------------------------------- #
# Strategy A: per-batch slab resident in VMEM (x read from HBM exactly once).
# --------------------------------------------------------------------------- #
def _slab_kernel(x_ref, wm_ref, w1_ref, b1_ref, g_ref, be_ref, w2_ref, b2_ref,
                 o_ref, *, hw_valid):
    x = x_ref[0]                                                     # (C, HWp), native dtype
    # conv_mask 1x1 (C -> 1): per-channel scale (VPU) + sublane reduce over C.
    logits = jnp.sum(x * wm_ref[...], axis=0, keepdims=True)         # (1, HWp) f32
    if hw_valid < x.shape[-1]:
        lane = jax.lax.broadcasted_iota(jnp.int32, logits.shape, 1)
        logits = jnp.where(lane < hw_valid, logits, _MASK)
    m = jnp.max(logits, axis=-1, keepdims=True)                       # (1, 1)
    p = jnp.exp(logits - m)                                           # (1, HWp), 0 at pad
    denom = jnp.sum(p, axis=-1, keepdims=True)                        # (1, 1)
    context = jnp.sum(x * p, axis=-1, keepdims=True) / denom          # (C, 1) f32
    y2 = _channel_mlp(context, w1_ref[...], b1_ref[...], g_ref[...],
                      be_ref[...], w2_ref[...], b2_ref[...])          # (C, 1)
    o_ref[0] = (x + y2.astype(x.dtype)).astype(o_ref.dtype)


# --------------------------------------------------------------------------- #
# Strategy B: phase-fused tiled kernel, grid = (B, 2, n_t).
#   phase 0: online-softmax attention pooling over HW tiles (+ MLP on last tile)
#   phase 1: residual broadcast add over the same HW tiles
# --------------------------------------------------------------------------- #
def _phase_kernel(x_ref, wm_ref, w1_ref, b1_ref, g_ref, be_ref, w2_ref, b2_ref,
                  o_ref, m_sc, l_sc, acc_sc, y2_sc, *, hw_valid, hw_tile):
    phase = pl.program_id(1)
    t = pl.program_id(2)

    @pl.when(phase == 0)
    def _pool():
        @pl.when(t == 0)
        def _init():
            m_sc[...] = jnp.full_like(m_sc, _MASK)
            l_sc[...] = jnp.zeros_like(l_sc)
            acc_sc[...] = jnp.zeros_like(acc_sc)

        x = x_ref[0]                                                  # (C, T)
        logits = jnp.sum(x * wm_ref[...], axis=0, keepdims=True)      # (1, T) f32
        if hw_valid % hw_tile != 0:
            # only the last tile contains padded lanes; masking is cheap everywhere
            lane = jax.lax.broadcasted_iota(jnp.int32, logits.shape, 1) + t * hw_tile
            logits = jnp.where(lane < hw_valid, logits, _MASK)

        m_prev = m_sc[...]
        m_new = jnp.maximum(m_prev, jnp.max(logits, axis=-1, keepdims=True))
        alpha = jnp.exp(m_prev - m_new)                               # (1, 1)
        p = jnp.exp(logits - m_new)                                   # (1, T)
        l_sc[...] = alpha * l_sc[...] + jnp.sum(p, axis=-1, keepdims=True)
        acc_sc[...] = alpha * acc_sc[...] + jnp.sum(x * p, axis=-1, keepdims=True)
        m_sc[...] = m_new

        @pl.when(t == pl.num_programs(2) - 1)
        def _finalize():
            context = acc_sc[...] / l_sc[...]          # exact divide; off the hot path
            y2_sc[...] = _channel_mlp(context, w1_ref[...], b1_ref[...], g_ref[...],
                                      be_ref[...], w2_ref[...], b2_ref[...])

    @pl.when(phase == 1)
    def _residual():
        x = x_ref[0]
        o_ref[0] = (x + y2_sc[...].astype(x.dtype)).astype(o_ref.dtype)


@functools.partial(jax.jit, static_argnames=("max_hw_tile",))
def context_block_forward(x, params, *, max_hw_tile=None):
    """x: (B, C, H, W); params: dict of weights. Returns (B, C, H, W).

    max_hw_tile: optional cap on the spatial tile; when set, forces the
    phase-tiled (online-softmax) path. Default: auto — slab-resident when the
    per-batch slab fits the VMEM budget, phase-tiled otherwise.
    """
    B, C, H, W = x.shape
    HW = H * W
    P = params["w1"].shape[0]
    itemsize = jnp.dtype(x.dtype).itemsize

    # Generation-aware VMEM budgeting (v7x: 64 MiB physical -> 32 MiB limit;
    # v5e/v6e: 128 MiB physical -> 64 MiB limit).
    cap = _vmem_capacity_bytes()
    vmem_limit = int(cap // 2)
    w_bytes = 2 * 4 * (2 * P * C + 2 * C + 3 * P)       # weights, double-buffered
    stream_budget = max(vmem_limit - w_bytes - (2 << 20), 1 << 20)

    wm_col = params["wm"].reshape(C, 1)                  # conv_mask weight as a column
    weight_args = (wm_col, params["w1"], params["b1"], params["gamma"],
                   params["beta"], params["w2"], params["b2"])

    def const_spec(shape):
        zeros = (0,) * len(shape)
        return pl.BlockSpec(shape, lambda *_: zeros)

    weight_specs = [const_spec(a.shape) for a in weight_args]

    HW128 = _round_up(HW, 128)
    slab_need = 4 * C * HW128 * itemsize                 # x tile + out tile, double-buffered
    use_slab = (max_hw_tile is None) and (slab_need <= stream_budget)

    x_flat = x.reshape(B, C, HW)

    if use_slab:
        HW_pad = HW128
        if HW_pad != HW:
            x_flat = jnp.pad(x_flat, ((0, 0), (0, 0), (0, HW_pad - HW)))
        kernel = functools.partial(_slab_kernel, hw_valid=HW)
        grid = (B,)
        x_spec = pl.BlockSpec((1, C, HW_pad), lambda b: (b, 0, 0))
        out_spec = pl.BlockSpec((1, C, HW_pad), lambda b: (b, 0, 0))
        scratch = []
        dims = ("parallel",)
        bytes_accessed = 2 * B * C * HW_pad * itemsize
    else:
        # Budget-derived lane-dense tile (multiple of 128).
        t_budget = (stream_budget // (4 * C * itemsize)) // 128 * 128
        T = max(int(t_budget), 128)
        if max_hw_tile is not None:
            T = min(T, max(128, (max_hw_tile // 128) * 128))
        T = min(T, HW128)
        HW_pad = _round_up(HW, T)
        n_t = HW_pad // T
        if HW_pad != HW:
            x_flat = jnp.pad(x_flat, ((0, 0), (0, 0), (0, HW_pad - HW)))
        kernel = functools.partial(_phase_kernel, hw_valid=HW, hw_tile=T)
        grid = (B, 2, n_t)
        x_spec = pl.BlockSpec((1, C, T), lambda b, p, t: (b, 0, t))
        # phase 0 parks the output window at (b, 0, 0); phase 1 streams real tiles.
        out_spec = pl.BlockSpec((1, C, T), lambda b, p, t: (b, 0, t * p))
        scratch = [pltpu.VMEM((1, 1), jnp.float32),      # running max
                   pltpu.VMEM((1, 1), jnp.float32),      # running softmax denom
                   pltpu.VMEM((C, 1), jnp.float32),      # running weighted sum
                   pltpu.VMEM((C, 1), jnp.float32)]      # y2 (channel-add term)
        dims = ("parallel", "arbitrary", "arbitrary")
        bytes_accessed = 3 * B * C * HW_pad * itemsize

    out_flat = pl.pallas_call(
        kernel,
        out_shape=jax.ShapeDtypeStruct((B, C, HW_pad), x.dtype),
        grid_spec=pltpu.PrefetchScalarGridSpec(
            num_scalar_prefetch=0,
            grid=grid,
            in_specs=[x_spec] + weight_specs,
            out_specs=out_spec,
            scratch_shapes=scratch),
        compiler_params=pltpu.CompilerParams(
            dimension_semantics=dims,
            vmem_limit_bytes=vmem_limit),
        cost_estimate=pl.CostEstimate(
            flops=5 * B * C * HW_pad,
            transcendentals=B * HW_pad,
            bytes_accessed=int(bytes_accessed)),
    )(x_flat, *weight_args)

    if HW_pad != HW:
        out_flat = out_flat[:, :, :HW]
    return out_flat.reshape(B, C, H, W)


# --------------------------------------------------------------------------- #
# Pure-JAX reference mirroring the PyTorch forward.
# --------------------------------------------------------------------------- #
def context_block_reference(x, params):
    B, C, H, W = x.shape
    HW = H * W
    xf = x.reshape(B, C, HW)
    logits = jnp.einsum("oc,bcs->bos", params["wm"], xf) + params["bm"][0, 0]   # (B,1,HW)
    sm = jax.nn.softmax(logits, axis=-1)
    context = jnp.einsum("bcs,bos->bco", xf, sm)                                # (B,C,1)
    y1 = jnp.einsum("pc,bco->bpo", params["w1"], context) + params["b1"][None]  # (B,P,1)
    mu = jnp.mean(y1, axis=1, keepdims=True)
    var = jnp.mean((y1 - mu) ** 2, axis=1, keepdims=True)
    yn = (y1 - mu) * jax.lax.rsqrt(var + _LN_EPS) * params["gamma"][None] + params["beta"][None]
    yr = jnp.maximum(yn, 0.0)
    y2 = jnp.einsum("cp,bpo->bco", params["w2"], yr) + params["b2"][None]       # (B,C,1)
    return x + y2.reshape(B, C, 1, 1)


def make_params(key, inplanes, planes):
    ks = jax.random.split(key, 6)
    scale = 0.1
    return {
        # conv_mask: Conv2d(C, 1, 1) -> weight (1, C), bias (1, 1)
        "wm": scale * jax.random.normal(ks[0], (1, inplanes), jnp.float32),
        "bm": scale * jax.random.normal(ks[1], (1, 1), jnp.float32),
        # channel_add_conv[0]: Conv2d(C, P, 1) -> weight (P, C), bias (P, 1)
        "w1": scale * jax.random.normal(ks[2], (planes, inplanes), jnp.float32),
        "b1": scale * jax.random.normal(ks[3], (planes, 1), jnp.float32),
        # channel_add_conv[1]: LayerNorm([P,1,1]) affine params
        "gamma": jnp.ones((planes, 1), jnp.float32),
        "beta": jnp.zeros((planes, 1), jnp.float32),
        # channel_add_conv[3]: Conv2d(P, C, 1) -> weight (C, P), bias (C, 1)
        "w2": scale * jax.random.normal(ks[4], (inplanes, planes), jnp.float32),
        "b2": scale * jax.random.normal(ks[5], (inplanes, 1), jnp.float32),
    }


if __name__ == "__main__":
    # ContextBlock(inplanes=32, ratio=0.25) -> planes = 8
    B, C = 2, 32
    ratio = 0.25
    P = int(C * ratio)

    key = jax.random.PRNGKey(0)
    kx1, kx2, kp = jax.random.split(key, 3)
    params = make_params(kp, C, P)

    # Case 1: HW = 256 (multiple of 128, no padding).
    # Case 2: HW = 225 (padded + in-kernel lane masking).
    for (H, W), kx in (((16, 16), kx1), ((15, 15), kx2)):
        x = jax.random.normal(kx, (B, C, H, W), jnp.float32)
        ref = context_block_reference(x, params)

        # Auto path (slab-resident at these sizes).
        out_slab = jax.block_until_ready(context_block_forward(x, params))
        # Forced phase-tiled path exercising the online-softmax accumulation.
        out_tiled = jax.block_until_ready(
            context_block_forward(x, params, max_hw_tile=128))

        assert out_slab.shape == (B, C, H, W)
        assert jnp.allclose(out_slab, ref, atol=1e-4, rtol=1e-4), \
            f"slab-path mismatch vs JAX reference at H=W={H}"
        assert jnp.allclose(out_tiled, ref, atol=1e-4, rtol=1e-4), \
            f"tiled-path mismatch vs JAX reference at H=W={H}"

    print("KERNEL_OK")
</pallas_src>

<mosaic_0001>
module attributes {stable_mosaic.version = 11 : i64} {
  func.func @_slab_kernel(%arg0: i32, %arg1: memref<1x32x256xf32, #tpu.memory_space<vmem>>, %arg2: memref<32x1xf32, #tpu.memory_space<vmem>>, %arg3: memref<8x32xf32, #tpu.memory_space<vmem>>, %arg4: memref<8x1xf32, #tpu.memory_space<vmem>>, %arg5: memref<8x1xf32, #tpu.memory_space<vmem>>, %arg6: memref<8x1xf32, #tpu.memory_space<vmem>>, %arg7: memref<32x8xf32, #tpu.memory_space<vmem>>, %arg8: memref<32x1xf32, #tpu.memory_space<vmem>>, %arg9: memref<1x32x256xf32, #tpu.memory_space<vmem>>) attributes {dimension_semantics = [#tpu.dimension_semantics<parallel>], iteration_bounds = array<i64: 2>, scalar_prefetch = 0 : i64, scratch_operands = 0 : i64, tpu.core_type = #tpu.core_type<tc>, window_params = [{transform_indices = @transform_0, window_bounds = array<i64: 1, 32, 256>}, {pipeline_mode = #tpu.pipeline_mode<synchronous>, transform_indices = @transform_1, window_bounds = array<i64: 32, 1>}, {pipeline_mode = #tpu.pipeline_mode<synchronous>, transform_indices = @transform_2, window_bounds = array<i64: 8, 32>}, {pipeline_mode = #tpu.pipeline_mode<synchronous>, transform_indices = @transform_3, window_bounds = array<i64: 8, 1>}, {pipeline_mode = #tpu.pipeline_mode<synchronous>, transform_indices = @transform_4, window_bounds = array<i64: 8, 1>}, {pipeline_mode = #tpu.pipeline_mode<synchronous>, transform_indices = @transform_5, window_bounds = array<i64: 8, 1>}, {pipeline_mode = #tpu.pipeline_mode<synchronous>, transform_indices = @transform_6, window_bounds = array<i64: 32, 8>}, {pipeline_mode = #tpu.pipeline_mode<synchronous>, transform_indices = @transform_7, window_bounds = array<i64: 32, 1>}, {transform_indices = @transform_8, window_bounds = array<i64: 1, 32, 256>}]} {
    %c0 = arith.constant 0 : index
    %c0_0 = arith.constant 0 : index
    %c0_1 = arith.constant 0 : index
    %0 = vector.load %arg1[%c0, %c0_0, %c0_1] : memref<1x32x256xf32, #tpu.memory_space<vmem>>, vector<1x32x256xf32>
    %1 = vector.shape_cast %0 : vector<1x32x256xf32> to vector<32x256xf32>
    %c0_2 = arith.constant 0 : index
    %c0_3 = arith.constant 0 : index
    %2 = vector.load %arg2[%c0_2, %c0_3] : memref<32x1xf32, #tpu.memory_space<vmem>>, vector<32x1xf32>
    %3 = vector.broadcast %2 : vector<32x1xf32> to vector<32x256xf32>
    %4 = arith.mulf %1, %3 : vector<32x256xf32>
    %cst = arith.constant dense<0.000000e+00> : vector<256xf32>
    %5 = vector.multi_reduction <add>, %4, %cst [0] : vector<32x256xf32> to vector<256xf32>
    %6 = vector.shape_cast %5 : vector<256xf32> to vector<1x256xf32>
    %cst_4 = arith.constant dense<0xFF800000> : vector<1xf32>
    %7 = vector.multi_reduction <maximumf>, %6, %cst_4 [1] : vector<1x256xf32> to vector<1xf32>
    %8 = vector.shape_cast %7 : vector<1xf32> to vector<1x1xf32>
    %9 = vector.broadcast %8 : vector<1x1xf32> to vector<1x256xf32>
    %10 = arith.subf %6, %9 : vector<1x256xf32>
    %11 = math.exp %10 : vector<1x256xf32>
    %cst_5 = arith.constant dense<0.000000e+00> : vector<1xf32>
    %12 = vector.multi_reduction <add>, %11, %cst_5 [1] : vector<1x256xf32> to vector<1xf32>
    %13 = vector.shape_cast %12 : vector<1xf32> to vector<1x1xf32>
    %14 = vector.broadcast %11 : vector<1x256xf32> to vector<32x256xf32>
    %15 = arith.mulf %1, %14 : vector<32x256xf32>
    %cst_6 = arith.constant dense<0.000000e+00> : vector<32xf32>
    %16 = vector.multi_reduction <add>, %15, %cst_6 [1] : vector<32x256xf32> to vector<32xf32>
    %17 = vector.shape_cast %16 : vector<32xf32> to vector<32x1xf32>
    %18 = vector.broadcast %13 : vector<1x1xf32> to vector<32x1xf32>
    %19 = arith.divf %17, %18 : vector<32x1xf32>
    %c0_7 = arith.constant 0 : index
    %c0_8 = arith.constant 0 : index
    %20 = vector.load %arg3[%c0_7, %c0_8] : memref<8x32xf32, #tpu.memory_space<vmem>>, vector<8x32xf32>
    %c0_9 = arith.constant 0 : index
    %c0_10 = arith.constant 0 : index
    %21 = vector.load %arg4[%c0_9, %c0_10] : memref<8x1xf32, #tpu.memory_space<vmem>>, vector<8x1xf32>
    %c0_11 = arith.constant 0 : index
    %c0_12 = arith.constant 0 : index
    %22 = vector.load %arg5[%c0_11, %c0_12] : memref<8x1xf32, #tpu.memory_space<vmem>>, vector<8x1xf32>
    %c0_13 = arith.constant 0 : index
    %c0_14 = arith.constant 0 : index
    %23 = vector.load %arg6[%c0_13, %c0_14] : memref<8x1xf32, #tpu.memory_space<vmem>>, vector<8x1xf32>
    %c0_15 = arith.constant 0 : index
    %c0_16 = arith.constant 0 : index
    %24 = vector.load %arg7[%c0_15, %c0_16] : memref<32x8xf32, #tpu.memory_space<vmem>>, vector<32x8xf32>
    %c0_17 = arith.constant 0 : index
    %c0_18 = arith.constant 0 : index
    %25 = vector.load %arg8[%c0_17, %c0_18] : memref<32x1xf32, #tpu.memory_space<vmem>>, vector<32x1xf32>
    %cst_19 = arith.constant dense<0.000000e+00> : vector<8x1xf32>
    %26 = tpu.matmul %20, %19, %cst_19 {dimension_numbers = #tpu.dot_dimension_numbers<[1], [0], [0], [1], [0, 0, 1, 1], [], []>} : vector<8x32xf32>, vector<32x1xf32>, vector<8x1xf32> -> vector<8x1xf32>
    %27 = arith.addf %26, %21 : vector<8x1xf32>
    %cst_20 = arith.constant dense<0.000000e+00> : vector<1xf32>
    %28 = vector.multi_reduction <add>, %27, %cst_20 [0] : vector<8x1xf32> to vector<1xf32>
    %29 = vector.shape_cast %28 : vector<1xf32> to vector<1x1xf32>
    %cst_21 = arith.constant 8.000000e+00 : f32
    %30 = vector.broadcast %cst_21 : f32 to vector<1x1xf32>
    %31 = arith.divf %29, %30 : vector<1x1xf32>
    %32 = vector.broadcast %31 : vector<1x1xf32> to vector<8x1xf32>
    %33 = arith.subf %27, %32 : vector<8x1xf32>
    %34 = vector.broadcast %31 : vector<1x1xf32> to vector<8x1xf32>
    %35 = arith.subf %27, %34 : vector<8x1xf32>
    %36 = arith.mulf %33, %35 : vector<8x1xf32>
    %cst_22 = arith.constant dense<0.000000e+00> : vector<1xf32>
    %37 = vector.multi_reduction <add>, %36, %cst_22 [0] : vector<8x1xf32> to vector<1xf32>
    %38 = vector.shape_cast %37 : vector<1xf32> to vector<1x1xf32>
    %cst_23 = arith.constant 8.000000e+00 : f32
    %39 = vector.broadcast %cst_23 : f32 to vector<1x1xf32>
    %40 = arith.divf %38, %39 : vector<1x1xf32>
    %41 = vector.broadcast %31 : vector<1x1xf32> to vector<8x1xf32>
    %42 = arith.subf %27, %41 : vector<8x1xf32>
    %cst_24 = arith.constant 9.99999974E-6 : f32
    %43 = vector.broadcast %cst_24 : f32 to vector<1x1xf32>
    %44 = arith.addf %40, %43 : vector<1x1xf32>
    %45 = math.rsqrt %44 : vector<1x1xf32>
    %46 = vector.broadcast %45 : vector<1x1xf32> to vector<8x1xf32>
    %47 = arith.mulf %42, %46 : vector<8x1xf32>
    %48 = arith.mulf %47, %22 : vector<8x1xf32>
    %49 = arith.addf %48, %23 : vector<8x1xf32>
    %cst_25 = arith.constant 0.000000e+00 : f32
    %50 = vector.broadcast %cst_25 : f32 to vector<8x1xf32>
    %51 = arith.maximumf %49, %50 : vector<8x1xf32>
    %cst_26 = arith.constant dense<0.000000e+00> : vector<32x1xf32>
    %52 = tpu.matmul %24, %51, %cst_26 {dimension_numbers = #tpu.dot_dimension_numbers<[1], [0], [0], [1], [0, 0, 1, 1], [], []>} : vector<32x8xf32>, vector<8x1xf32>, vector<32x1xf32> -> vector<32x1xf32>
    %53 = arith.addf %52, %25 : vector<32x1xf32>
    %54 = vector.broadcast %53 : vector<32x1xf32> to vector<32x256xf32>
    %55 = arith.addf %1, %54 : vector<32x256xf32>
    %c0_27 = arith.constant 0 : index
    %c0_28 = arith.constant 0 : index
    %c0_29 = arith.constant 0 : index
    %56 = vector.load %arg9[%c0_27, %c0_28, %c0_29] : memref<1x32x256xf32, #tpu.memory_space<vmem>>, vector<1x32x256xf32>
    %57 = vector.shape_cast %56 : vector<1x32x256xf32> to vector<32x256xf32>
    %58 = vector.shape_cast %55 : vector<32x256xf32> to vector<1x32x256xf32>
    tpu.vector_store %arg9[%c0_27, %c0_28, %c0_29], %58 {strides = array<i32>} : memref<1x32x256xf32, #tpu.memory_space<vmem>>, vector<1x32x256xf32>,
    return
  }
  func.func @transform_0(%arg0: i32) -> (i32, i32, i32) {
    %c0_i32 = arith.constant 0 : i32
    %c0_i32_0 = arith.constant 0 : i32
    %c0_i32_1 = arith.constant 0 : i32
    return %arg0, %c0_i32, %c0_i32_0 : i32, i32, i32
  }
  func.func @transform_1(%arg0: i32) -> (i32, i32) {
    %c0_i32 = arith.constant 0 : i32
    %c0_i32_0 = arith.constant 0 : i32
    %c0_i32_1 = arith.constant 0 : i32
    return %c0_i32, %c0_i32_0 : i32, i32
  }
  func.func @transform_2(%arg0: i32) -> (i32, i32) {
    %c0_i32 = arith.constant 0 : i32
    %c0_i32_0 = arith.constant 0 : i32
    %c0_i32_1 = arith.constant 0 : i32
    return %c0_i32, %c0_i32_0 : i32, i32
  }
  func.func @transform_3(%arg0: i32) -> (i32, i32) {
    %c0_i32 = arith.constant 0 : i32
    %c0_i32_0 = arith.constant 0 : i32
    %c0_i32_1 = arith.constant 0 : i32
    return %c0_i32, %c0_i32_0 : i32, i32
  }
  func.func @transform_4(%arg0: i32) -> (i32, i32) {
    %c0_i32 = arith.constant 0 : i32
    %c0_i32_0 = arith.constant 0 : i32
    %c0_i32_1 = arith.constant 0 : i32
    return %c0_i32, %c0_i32_0 : i32, i32
  }
  func.func @transform_5(%arg0: i32) -> (i32, i32) {
    %c0_i32 = arith.constant 0 : i32
    %c0_i32_0 = arith.constant 0 : i32
    %c0_i32_1 = arith.constant 0 : i32
    return %c0_i32, %c0_i32_0 : i32, i32
  }
  func.func @transform_6(%arg0: i32) -> (i32, i32) {
    %c0_i32 = arith.constant 0 : i32
    %c0_i32_0 = arith.constant 0 : i32
    %c0_i32_1 = arith.constant 0 : i32
    return %c0_i32, %c0_i32_0 : i32, i32
  }
  func.func @transform_7(%arg0: i32) -> (i32, i32) {
    %c0_i32 = arith.constant 0 : i32
    %c0_i32_0 = arith.constant 0 : i32
    %c0_i32_1 = arith.constant 0 : i32
    return %c0_i32, %c0_i32_0 : i32, i32
  }
  func.func @transform_8(%arg0: i32) -> (i32, i32, i32) {
    %c0_i32 = arith.constant 0 : i32
    %c0_i32_0 = arith.constant 0 : i32
    %c0_i32_1 = arith.constant 0 : i32
    return %arg0, %c0_i32, %c0_i32_0 : i32, i32, i32
  }
}

</mosaic_0001>

<bundles_post_ra>
// kernel: context_block_forward.1
= control target key start
LH: loop header
LB: loop body
LE: loop exit
PB: predicated region body
PF: predicated region fallthrough
CT: control target
= control target key end

     0   :  { %s826_s27 = smov 0   ;;  %s942_s0 = inlined_call_operand.vmem [shape: f32[2,32,256], index: 0, kind: input, shape index: {}]   ;;  %s943_s1 = inlined_call_operand.vmem [shape: f32[32,1], index: 1, kind: input, shape index: {}]   ;;  %s944_s2 = inlined_call_operand.vmem [shape: f32[8,32], index: 2, kind: input, shape index: {}]   ;;  %s945_s3 = inlined_call_operand.vmem [shape: f32[8,1], index: 3, kind: input, shape index: {}]   ;;  %s946_s4 = inlined_call_operand.vmem [shape: f32[8,1], index: 4, kind: input, shape index: {}]   ;;  %s947_s5 = inlined_call_operand.vmem [shape: f32[8,1], index: 5, kind: input, shape index: {}]   ;;  %s948_s6 = inlined_call_operand.vmem [shape: f32[32,8], index: 6, kind: input, shape index: {}]   ;;  %s949_s7 = inlined_call_operand.vmem [shape: f32[32,1], index: 7, kind: input, shape index: {}]   ;;  %s950_s8 = inlined_call_operand.vmem [shape: f32[2,32,256], index: 8, kind: output, shape index: {}]  }
   0x1 LB: > { %s702_s28 = sadd.s32 4294967295, %s776_s27   ;;  %p706_p0 = scmp.ge.s32.totalorder %s776_s27, 1  ;;  %s776_s27 = sphi %s826_s27, %s18_s27  }
   0x2   : > { %p262_p1 = scmp.lt.s32.totalorder %s776_s27, 3 }
   0x4   : > { %p263_p2 = pnand %p706_p0, %p262_p1 }
   0x5   : > { %p296_p3 = scmp.lt.s32.totalorder (!%p263_p2), %s702_s28, 1 }
   0x6   : > { %266 = sbr.rel (%p263_p2) target bundleno = 1070 (0x42e), region = 52 }
   0xb   : > { %v316_v0 = vld [vmem:[%s943_s1 + $0x10] sm:$0xff]  ;;  %v314_v1 = vld [vmem:[%s943_s1] sm:$0xff]  ;;  %v778_v2 = vmov 0   ;;  %v317_v3 = vld [vmem:[%s943_s1 + $0x18] sm:$0xff]  ;;  %s952_s28 = smov (!%p296_p3, %s702_s28), 1  ;;  %vm780_vm0 = vmmov 0  }
   0xc   : > { %761 = vset.pattern.permute.xlu1 %v778_v2  ;;  %760 = vset.pattern.permute.xlu0 %v778_v2  ;;  %v315_v4 = vld [vmem:[%s943_s1 + $0x8] sm:$0xff]  ;;  %s718_s15 = sshll.u32 %s952_s28, 6  ;;  %vm413_vm1 = vcmask 261120   ;;  %vm513_vm2 = vcmask 64512   ;;  %vm487_vm3 = vcmask 7168  }
   0xd   : > { %330 = vperm.xlu1 %761, %v316_v0   ;;  %320 = vperm.xlu0 %760, %v314_v1   ;;  %s300_s18 = scalar_lea.vmem %s942_s0, %s718_s15  ;;  %v779_v0 = vmov 0.0   ;;  %s305_s26 = scalar_lea.vmem %s950_s8, %s718_s15 }
   0xe   : > { %v854_v7 = vld [vmem:[%s300_s18] sm:$0xff]  ;;  %v856_v8 = vld [vmem:[%s300_s18 + $0x8] sm:$0xff]  ;;  %v858_v9 = vld [vmem:[%s300_s18 + $0x10] sm:$0xff]  ;;  %730 = vmatprep.subr.mxu0 %v779_v0  ;;  %738 = vmatprep.mubr.msk.f32.mxu0 %vm780_vm0, %v779_v0 }
   0xf   : > { %v860_v10 = vld [vmem:[%s300_s18 + $0x18] sm:$0xff]  ;;  %v862_v11 = vld [vmem:[%s300_s18 + $0x20] sm:$0xff]  ;;  %v864_v12 = vld [vmem:[%s300_s18 + $0x28] sm:$0xff] }
  0x10   : > { %v870_v19 = vld [vmem:[%s300_s18 + $0x30] sm:$0xff]  ;;  %v872_v20 = vld [vmem:[%s300_s18 + $0x38] sm:$0xff] }
  0x11   : > { %335 = vperm.xlu1 %761, %v317_v3   ;;  %325 = vperm.xlu0 %760, %v315_v4  }
  0x88   : > { %v331_v5 = vpop.permute.xlu1 %330  ;;  %v321_v6 = vpop.permute.xlu0 %320 }
  0x89   : > { %v338_v14 = vmul.f32 %v321_v6, %v854_v7  ;;  %v339_v15 = vmul.f32 %v321_v6, %v856_v8  ;;  %v342_v21 = vmul.f32 %v331_v5, %v862_v11  ;;  %v343_v22 = vmul.f32 %v331_v5, %v864_v12 }
  0x8c   : > { %v326_v13 = vpop.permute.xlu0 %325  ;;  %v336_v18 = vpop.permute.xlu1 %335 }
  0x8d   : > { %v340_v16 = vmul.f32 %v326_v13, %v858_v9  ;;  %v341_v17 = vmul.f32 %v326_v13, %v860_v10  ;;  %v344_v25 = vmul.f32 %v336_v18, %v870_v19  ;;  %v345_v26 = vmul.f32 %v336_v18, %v872_v20  ;;  %v405_v18 = vld [vmem:[%s948_s6] sm:$0xff] }
  0x8e   : > { %743 = vmatprep.mubr.msk.f32.mxu1 %vm513_vm2, %v405_v18 }
  0x8f   : > { %v346_v23 = vadd.f32 %v340_v16, %v338_v14  ;;  %v355_v24 = vadd.f32 %v341_v17, %v339_v15  ;;  %v401_v17 = vld [vmem:[%s944_s2] sm:$0xff] }
  0x91   : > { %v347_v27 = vadd.f32 %v346_v23, %v342_v21  ;;  %v356_v28 = vadd.f32 %v355_v24, %v343_v22  ;;  %v402_v21 = vld [vmem:[%s945_s3] sm:$0xff] }
  0x93   : > { %v348_v29 = vadd.f32 %v347_v27, %v344_v25  ;;  %v357_v30 = vadd.f32 %v356_v28, %v345_v26 }
  0x95   : > { %v349_v31 = vrot.slane %v348_v29, 4  ;;  %v358_v32 = vrot.slane %v357_v30, 4 }
  0x97   : > { %v350_v33 = vadd.f32 %v349_v31, %v348_v29  ;;  %v359_v34 = vadd.f32 %v358_v32, %v357_v30 }
  0x99   : > { %v351_v35 = vrot.slane %v350_v33, 2  ;;  %v360_v36 = vrot.slane %v359_v34, 2 }
  0x9b   : > { %v352_v37 = vadd.f32 %v351_v35, %v350_v33  ;;  %v361_v38 = vadd.f32 %v360_v36, %v359_v34 }
  0x9d   : > { %v353_v39 = vrot.slane %v352_v37, 1  ;;  %v362_v40 = vrot.slane %v361_v38, 1 }
  0x9f   : > { %v354_v41 = vadd.f32 %v353_v39, %v352_v37  ;;  %v363_v42 = vadd.f32 %v362_v40, %v361_v38 }
  0xa1   : > { %v364_v43 = vmax.f32 %v354_v41, %v363_v42 }
  0xa3   : > { %365 = vmax.xlane.f32.xlu0 %v364_v43 }
 0x12c   : > { %v366_v44 = vpop.xlane.xlu0 %365 }
 0x12d   : > { %v367_v45 = vsub.f32 %v354_v41, %v366_v44  ;;  %v368_v46 = vsub.f32 %v363_v42, %v366_v44 }
 0x12f   : > { %v369_v47 = vmul.f32 1.442695, %v367_v45  ;;  %v371_v48 = vmul.f32 1.442695, %v368_v46  ;;  %v403_v45 = vld [vmem:[%s946_s4] sm:$0xff] }
 0x131   : > { %762 = vpow2.f32 %v369_v47  ;;  %v404_v47 = vld [vmem:[%s947_s5] sm:$0xff] }
 0x132   : > { %764 = vpow2.f32 %v371_v48 }
 0x13e   : > { %v763_v49 = vpop.eup %762 }
 0x13f   : > { %v765_v50 = vpop.eup %764  ;;  %v382_v51 = vmul.f32 %v763_v49, %v870_v19  ;;  %v378_v54 = vmul.f32 %v763_v49, %v858_v9  ;;  %v380_v57 = vmul.f32 %v763_v49, %v862_v11  ;;  %v376_v61 = vmul.f32 %v763_v49, %v854_v7 }
 0x140   : > { %v373_v52 = vadd.f32 %v765_v50, %v763_v49  ;;  %v383_v53 = vmul.f32 %v765_v50, %v872_v20  ;;  %v379_v55 = vmul.f32 %v765_v50, %v860_v10  ;;  %v381_v58 = vmul.f32 %v765_v50, %v864_v12 }
 0x141   : > { %v377_v62 = vmul.f32 %v765_v50, %v856_v8 }
 0x142   : > { %374 = vadd.xlane.f32.xlu1 %v373_v52  ;;  %v393_v56 = vadd.f32 %v383_v53, %v382_v51  ;;  %v387_v59 = vadd.f32 %v379_v55, %v378_v54  ;;  %v390_v60 = vadd.f32 %v381_v58, %v380_v57  ;;  %v406_v51 = vld [vmem:[%s948_s6 + $0x8] sm:$0xff]  ;;  %v407_v52 = vld [vmem:[%s948_s6 + $0x10] sm:$0xff]  ;;  %v408_v53 = vld [vmem:[%s948_s6 + $0x18] sm:$0xff] }
 0x143   : > { %v384_v63 = vadd.f32 %v377_v62, %v376_v61  ;;  %v410_v54 = vld [vmem:[%s949_s7 + $0x8] sm:$0xff]  ;;  %v411_v61 = vld [vmem:[%s949_s7 + $0x10] sm:$0xff] }
 0x144   : > { %394 = vadd.xlane.f32.xlu0 %v393_v56  ;;  %v409_v56 = vld [vmem:[%s949_s7] sm:$0xff] }
 0x146   : > { %388 = vadd.xlane.f32.xlu1 %v387_v59 }
 0x148   : > { %391 = vadd.xlane.f32.xlu0 %v390_v60 }
 0x14c   : > { %385 = vadd.xlane.f32.xlu0 %v384_v63 }
 0x1cb   : > { %v375_v1 = vpop.xlane.xlu1 %374 }
 0x1cc   : > { %766 = vrcp.f32 %v375_v1 }
 0x1cd   : > { %v395_v2 = vpop.xlane.xlu0 %394 }
 0x1cf   : > { %v389_v13 = vpop.xlane.xlu1 %388 }
 0x1d1   : > { %v392_v4 = vpop.xlane.xlu0 %391 }
 0x1d5   : > { %v386_v15 = vpop.xlane.xlu0 %385 }
 0x1d9   : > { %v767_v3 = vpop.eup %766 }
 0x1da   : > { %v400_v5 = vmul.f32 %v767_v3, %v395_v2  ;;  %v399_v6 = vmul.f32 %v767_v3, %v392_v4  ;;  %v398_v14 = vmul.f32 %v767_v3, %v389_v13  ;;  %v397_v16 = vmul.f32 %v767_v3, %v386_v15 }
 0x1dc   : > { %731 = vmatpush3.msra.mxu0 %v400_v5 }
 0x1dd   : > { %732 = vmatprep.subr.mxu0 %v779_v0 }
 0x1de   : > { %733 = vmatpush3.msra.mxu0 %v399_v6 }
 0x1df   : > { %734 = vmatprep.subr.mxu0 %v779_v0 }
 0x1e0   : > { %735 = vmatpush3.msra.mxu0 %v398_v14 }
 0x1e1   : > { %736 = vmatprep.subr.mxu0 %v779_v0  ;;  %v412_v0 = vld [vmem:[%s949_s7 + $0x18] sm:$0xff] }
 0x1e2   : > { %737 = vmatpush3.msra.mxu0 %v397_v16 }
 0x1e3   : > { %739 = vmatmul.mubr.msk.f32.vlgmr.msra.gmra.mxu0 %vm413_vm1, %v401_v17 }
 0x2a3   : > { %v483_v22 = vpop.f32.mrf.mxu0 }
 0x2a4   : > { %v484_v23 = vadd.f32 %v483_v22, %v402_v21 }
 0x2a5   : > { %v740_v24 = vpop.f32.mrf.mxu0 }
 0x2a6   : > { %v488_v25 = vsel %vm487_vm3, %v484_v23, 0.0 }
 0x2a7   : > { %v489_v26 = vrot.slane %v488_v25, 4 }
 0x2a9   : > { %v490_v27 = vadd.f32 %v489_v26, %v488_v25 }
 0x2ab   : > { %v491_v28 = vrot.slane %v490_v27, 2 }
 0x2ad   : > { %v492_v29 = vadd.f32 %v491_v28, %v490_v27 }
 0x2af   : > { %v493_v30 = vrot.slane %v492_v29, 1 }
 0x2b1   : > { %v494_v31 = vadd.f32 %v493_v30, %v492_v29 }
 0x2b3   : > { %v496_v32 = vmul.f32 0.125, %v494_v31 }
 0x2b5   : > { %v497_v33 = vsub.f32 %v484_v23, %v496_v32 }
 0x2b7   : > { %v498_v34 = vmul.f32 %v497_v33, %v497_v33 }
 0x2b9   : > { %v499_v35 = vsel %vm487_vm3, %v498_v34, 0.0 }
 0x2ba   : > { %v500_v36 = vrot.slane %v499_v35, 4 }
 0x2bc   : > { %v501_v37 = vadd.f32 %v500_v36, %v499_v35 }
 0x2be   : > { %v502_v38 = vrot.slane %v501_v37, 2 }
 0x2c0   : > { %v503_v39 = vadd.f32 %v502_v38, %v501_v37 }
 0x2c2   : > { %v504_v40 = vrot.slane %v503_v39, 1 }
 0x2c4   : > { %v505_v41 = vadd.f32 %v504_v40, %v503_v39 }
 0x2c6   : > { %v506_v42 = vmul.f32 0.125, %v505_v41 }
 0x2c8   : > { %v507_v43 = vadd.f32 1e-05, %v506_v42 }
 0x2ca   : > { %768 = vrsqrt.f32 %v507_v43 }
 0x2d7   : > { %v769_v44 = vpop.eup %768 }
 0x2d8   : > { %v509_v46 = vmul.f32 %v769_v44, %v497_v33 }
 0x2da   : > { %v510_v48 = vmul.f32 %v509_v46, %v403_v45 }
 0x2dc   : > { %v511_v49 = vadd.f32 %v510_v48, %v404_v47 }
 0x2de   : > { %v512_v50 = vmax.f32 %v511_v49, 0.0 }
 0x2e0   : > { %741 = vmatprep.subr.mxu1 %v512_v50 }
 0x2e1   : > { %742 = vmatpush3.msra.mxu1 %v512_v50 }
 0x2e2   : > { %744 = vmatmul.mubr.msk.f32.vlgmr.msra.gmra.mxu1 %vm513_vm2, %v406_v51 }
 0x2e3   : > { %746 = vmatprep.mubr.msk.f32.mxu1 %vm513_vm2, %v407_v52 }
 0x2e6   : > { %747 = vmatmul.mubr.msk.f32.gmra.mxu1 %vm513_vm2, %v408_v53 }
 0x3a2   : > { %v745_v55 = vpop.f32.mrf.mxu1 }
 0x3a3   : > { %v598_v57 = vadd.f32 %v745_v55, %v410_v54 }
 0x3a4   : > { %v592_v58 = vpop.f32.mrf.mxu1 }
 0x3a5   : > { %v593_v59 = vadd.f32 %v592_v58, %v409_v56  ;;  %618 = vperm.xlu0 %760, %v598_v57  }
 0x3a6   : > { %v748_v60 = vpop.f32.mrf.mxu1 }
 0x3a7   : > { %613 = vperm.xlu1 %761, %v593_v59   ;;  %v608_v1 = vadd.f32 %v748_v60, %v412_v0 }
 0x3a8   : > { %v602_v62 = vpop.f32.mrf.mxu1 }
 0x3a9   : > { %v603_v63 = vadd.f32 %v602_v62, %v411_v61 }
 0x3ab   : > { %623 = vperm.xlu1 %761, %v603_v63  }
 0x3af   : > { %628 = vperm.xlu1 %761, %v608_v1  }
 0x420   : > { %v619_v2 = vpop.permute.xlu0 %618 }
 0x421   : > { %v633_v3 = vadd.f32 %v619_v2, %v858_v9  ;;  %v634_v4 = vadd.f32 %v619_v2, %v860_v10 }
 0x422   : > { %v614_v5 = vpop.permute.xlu1 %613 }
 0x423   : > { %641 = vst [vmem:[%s305_s26 + $0x10] sm:$0xff] %v633_v3  ;;  %642 = vst [vmem:[%s305_s26 + $0x18] sm:$0xff] %v634_v4  ;;  %v631_v6 = vadd.f32 %v614_v5, %v854_v7  ;;  %v632_v13 = vadd.f32 %v614_v5, %v856_v8 }
 0x425   : > { %639 = vst [vmem:[%s305_s26] sm:$0xff] %v631_v6  ;;  %640 = vst [vmem:[%s305_s26 + $0x8] sm:$0xff] %v632_v13 }
 0x426   : > { %v624_v14 = vpop.permute.xlu1 %623 }
 0x427   : > { %v635_v15 = vadd.f32 %v624_v14, %v862_v11  ;;  %v636_v16 = vadd.f32 %v624_v14, %v864_v12 }
 0x429   : > { %643 = vst [vmem:[%s305_s26 + $0x20] sm:$0xff] %v635_v15  ;;  %644 = vst [vmem:[%s305_s26 + $0x28] sm:$0xff] %v636_v16 }
 0x42a   : > { %v629_v17 = vpop.permute.xlu1 %628 }
 0x42b   : > { %v637_v9 = vadd.f32 %v629_v17, %v870_v19  ;;  %v638_v10 = vadd.f32 %v629_v17, %v872_v20 }
 0x42d   : > { %645 = vst [vmem:[%s305_s26 + $0x30] sm:$0xff] %v637_v9  ;;  %646 = vst [vmem:[%s305_s26 + $0x38] sm:$0xff] %v638_v10 }
 0x42e PF: > { %s18_s27 = sadd.s32 1, %s776_s27  }
 0x42f   : > { %p15_p4 = scmp.ge.s32.totalorder %s18_s27, 4  }
 0x431   :  { %17 = sbr.rel (!%p15_p4) target bundleno = 1 (0x1), region = 82 }

</bundles_post_ra>
